<compile_context>
chip_gen: v5e
topology: v5e:2x2
jax: 0.10.0
libtpu: 0.0.40
codegen_flags: <defaults>
</compile_context>

<pallas_src>
import math

import jax
import jax.numpy as jnp
from jax import lax
from jax.experimental import pallas as pl
from jax.experimental.pallas import tpu as pltpu

LANES = 128
SUBLANES = 8
CHUNK_ROWS = 1024          # compute-chunk rows inside a block (512 KiB f32 temps)


def _cdiv(a, b):
    return -(-a // b)


def _vmem_capacity_bytes():
    try:
        cap = getattr(pltpu.get_tpu_info(), "vmem_capacity_bytes", None)
        if cap:
            return int(cap)
    except Exception:
        pass
    return 64 << 20            # conservative fallback (v7x per-TensorCore VMEM)


def _tpu_generation_params():
    """(num_splits, max_row_tile, vmem_capacity) chosen per TPU generation."""
    try:
        kind = jax.devices()[0].device_kind.lower()
    except Exception:
        kind = ""
    single_tc = any(s in kind for s in
                    ("v5e", "v5 lite", "v5lite", "v6e", "v6 lite", "v6lite",
                     "trillium"))
    cap = _vmem_capacity_bytes()
    num_splits = 1 if single_tc else 2           # 2 TensorCores on v7x/v4/v5p
    max_row_tile = 8192 if cap >= (96 << 20) else 4096   # 4 / 2 MiB f32 per input block
    return num_splits, max_row_tile, cap


def _plan_grid(m_rows, num_splits, max_row_tile):
    """Pick (num_splits, row_tile, blocks_per_split) so every block is full/in-bounds."""
    while True:
        blocks = max(num_splits, _cdiv(m_rows, max_row_tile))
        blocks = _cdiv(blocks, num_splits) * num_splits       # multiple of splits
        row_tile = ((m_rows // blocks) // SUBLANES) * SUBLANES
        if row_tile >= SUBLANES:
            return num_splits, row_tile, blocks // num_splits
        if num_splits == 1:
            return None                   # too small for the kernel; jnp handles it
        num_splits = 1


def _focal_weight(one_minus_pt, gamma):
    if gamma == 2.0:
        return one_minus_pt * one_minus_pt          # one VPU mul, no transcendentals
    if float(gamma).is_integer() and gamma >= 0.0:
        return lax.integer_pow(one_minus_pt, int(gamma))
    # Non-integer exponent: clamp base so a slightly-negative (1-pt) doesn't NaN.
    return jnp.power(jnp.maximum(one_minus_pt, 0.0), gamma)


def _focal_terms(x, t, alpha, gamma):
    """Per-element focal loss in f32 (shared by kernel chunks and the jnp tail)."""
    if x.dtype != jnp.float32:
        x = x.astype(jnp.float32)
    if t.dtype != jnp.float32:
        t = t.astype(jnp.float32)
    # Stable BCE-with-logits (== PyTorch BCEWithLogitsLoss, reduction='none').
    bce = jnp.maximum(x, 0.0) - x * t + jnp.log1p(jnp.exp(-jnp.abs(x)))
    pt = jnp.exp(-bce)
    f = bce if alpha == 1.0 else alpha * bce        # skip the multiply when alpha == 1
    return f * _focal_weight(1.0 - pt, gamma)


def _make_kernel(alpha, gamma, row_tile, chunk_rows):
    alpha = float(alpha)
    gamma = float(gamma)

    def kernel(x_ref, t_ref, o_ref):
        @pl.when(pl.program_id(1) == 0)
        def _init():
            o_ref[...] = jnp.zeros_like(o_ref)

        def accumulate(row0, nrows):
            # nrows is static (multiple of 8); row0 may be traced.
            x = x_ref[pl.ds(row0, nrows), :]
            t = t_ref[pl.ds(row0, nrows), :]
            f = _focal_terms(x, t, alpha, gamma)
            # Lane/sublane-parallel partial sum into the resident (8,128) output
            # block: pure VPU vreg adds, no in-kernel cross-lane reduce.
            o_ref[...] += f.reshape(nrows // SUBLANES, SUBLANES, LANES).sum(axis=0)

        # Chunked so in-kernel temporaries are O(chunk_rows), not O(row_tile).
        nfull = row_tile // chunk_rows
        rem = row_tile - nfull * chunk_rows
        if nfull == 1:
            accumulate(0, chunk_rows)
        elif nfull > 1:
            def chunk_body(j, carry):
                accumulate(pl.multiple_of(j * chunk_rows, chunk_rows), chunk_rows)
                return carry
            lax.fori_loop(0, nfull, chunk_body, 0)
        if rem:
            accumulate(nfull * chunk_rows, rem)

    return kernel


def focal_loss(inputs, targets, alpha: float = 1.0, gamma: float = 2.0):
    """Scalar focal loss (mean reduction); bulk computed in a Pallas TPU kernel."""
    assert inputs.shape == targets.shape
    n_total = int(math.prod(inputs.shape))
    assert n_total > 0

    num_splits, max_row_tile, vmem_cap = _tpu_generation_params()

    x_flat = inputs.reshape(-1)
    t_flat = targets.reshape(-1)

    m_rows = n_total // LANES
    n_rows_elems = m_rows * LANES
    plan = _plan_grid(m_rows, num_splits, max_row_tile) if m_rows >= SUBLANES else None

    total = jnp.float32(0.0)
    kernel_elems = 0

    if plan is not None:
        num_splits, row_tile, blocks_per_split = plan
        chunk_rows = min(CHUNK_ROWS, row_tile)
        kernel_rows = num_splits * blocks_per_split * row_tile      # <= m_rows
        kernel_elems = kernel_rows * LANES

        # Lane-dense (rows, 128) view.  When n_total % 128 == 0 (common case)
        # this is a free bitcast reshape: no pad, no copy, no mask anywhere.
        # TODO(synk): for n_total % 128 != 0 the prefix slice may materialize
        # one copy; the sub-128 remainder always goes to the jnp tail below.
        x_main = x_flat if n_rows_elems == n_total else x_flat[:n_rows_elems]
        t_main = t_flat if n_rows_elems == n_total else t_flat[:n_rows_elems]
        x2 = x_main.reshape(m_rows, LANES)
        t2 = t_main.reshape(m_rows, LANES)

        kernel = _make_kernel(alpha, gamma, row_tile, chunk_rows)

        # VMEM budget: double-buffered input windows + chunk-sized temporaries
        # (+ output/slack), capped well below physical VMEM for headroom.
        block_in_bytes = row_tile * LANES * (x2.dtype.itemsize + t2.dtype.itemsize)
        temp_bytes = 8 * chunk_rows * LANES * 4
        vmem_needed = 2 * block_in_bytes + temp_bytes + (2 << 20)
        vmem_limit = int(min(max(16 << 20, vmem_needed), (vmem_cap * 3) // 4))

        in_map = lambda c, i: (c * blocks_per_split + i, 0)
        partials = pl.pallas_call(
            kernel,
            out_shape=jax.ShapeDtypeStruct((num_splits, SUBLANES, LANES),
                                           jnp.float32),
            grid_spec=pltpu.PrefetchScalarGridSpec(
                num_scalar_prefetch=0,
                grid=(num_splits, blocks_per_split),
                in_specs=[
                    pl.BlockSpec((row_tile, LANES), in_map),
                    pl.BlockSpec((row_tile, LANES), in_map),
                ],
                out_specs=pl.BlockSpec((None, SUBLANES, LANES),
                                       lambda c, i: (c, 0, 0)),
            ),
            compiler_params=pltpu.CompilerParams(
                dimension_semantics=("parallel", "arbitrary"),
                vmem_limit_bytes=vmem_limit,
            ),
        )(x2, t2)
        total = total + jnp.sum(partials, dtype=jnp.float32)

    if kernel_elems < n_total:
        # Tiny contiguous leftover (uncovered rows + sub-128 remainder): plain jnp.
        total = total + jnp.sum(
            _focal_terms(x_flat[kernel_elems:], t_flat[kernel_elems:],
                         float(alpha), float(gamma)),
            dtype=jnp.float32)

    return total / jnp.float32(n_total)


def focal_loss_ref(inputs, targets, alpha: float = 1.0, gamma: float = 2.0):
    x = inputs.astype(jnp.float32)
    t = targets.astype(jnp.float32)
    bce = jnp.maximum(x, 0.0) - x * t + jnp.log1p(jnp.exp(-jnp.abs(x)))
    pt = jnp.exp(-bce)
    return jnp.mean(alpha * (1.0 - pt) ** gamma * bce)


if __name__ == "__main__":
    key = jax.random.PRNGKey(0)
    k1, k2 = jax.random.split(key)

    # Logits and binary targets, NCHW-shaped like a segmentation/classifier head.
    x = jax.random.normal(k1, (2, 4, 16, 16), dtype=jnp.float32)
    t = (jax.random.uniform(k2, (2, 4, 16, 16)) > 0.5).astype(jnp.float32)

    loss_fn = jax.jit(lambda a, b: focal_loss(a, b, alpha=1.0, gamma=2.0))
    out = jax.block_until_ready(loss_fn(x, t))

    ref = focal_loss_ref(x, t, alpha=1.0, gamma=2.0)
    assert jnp.allclose(out, ref, rtol=1e-5, atol=1e-6), (out, ref)

    print("KERNEL_OK")
</pallas_src>

<mosaic_0001>
module attributes {stable_mosaic.version = 11 : i64} {
  func.func @kernel(%arg0: i32, %arg1: i32, %arg2: memref<8x128xf32, #tpu.memory_space<vmem>>, %arg3: memref<8x128xf32, #tpu.memory_space<vmem>>, %arg4: memref<1x8x128xf32, #tpu.memory_space<vmem>>) attributes {dimension_semantics = [#tpu.dimension_semantics<parallel>, #tpu.dimension_semantics<arbitrary>], iteration_bounds = array<i64: 2, 1>, scalar_prefetch = 0 : i64, scratch_operands = 0 : i64, tpu.core_type = #tpu.core_type<tc>, window_params = [{transform_indices = @transform_0, window_bounds = array<i64: 8, 128>}, {transform_indices = @transform_1, window_bounds = array<i64: 8, 128>}, {transform_indices = @transform_2, window_bounds = array<i64: 1, 8, 128>}]} {
    %c0_i32 = arith.constant 0 : i32
    %0 = arith.cmpi eq, %arg1, %c0_i32 : i32
    %1 = arith.extui %0 : i1 to i32
    %c0_i32_0 = arith.constant 0 : i32
    %2 = arith.cmpi ne, %1, %c0_i32_0 : i32
    scf.if %2 {
      %cst_14 = arith.constant 0.000000e+00 : f32
      %30 = vector.broadcast %cst_14 : f32 to vector<8x128xf32>
      %c0_15 = arith.constant 0 : index
      %c0_16 = arith.constant 0 : index
      %c0_17 = arith.constant 0 : index
      %31 = vector.load %arg4[%c0_15, %c0_16, %c0_17] : memref<1x8x128xf32, #tpu.memory_space<vmem>>, vector<1x8x128xf32>
      %32 = vector.shape_cast %31 : vector<1x8x128xf32> to vector<8x128xf32>
      %33 = vector.shape_cast %30 : vector<8x128xf32> to vector<1x8x128xf32>
      tpu.vector_store %arg4[%c0_15, %c0_16, %c0_17], %33 {strides = array<i32>} : memref<1x8x128xf32, #tpu.memory_space<vmem>>, vector<1x8x128xf32>,
    } else {
    }
    %c0 = arith.constant 0 : index
    %c0_1 = arith.constant 0 : index
    %3 = vector.load %arg2[%c0, %c0_1] : memref<8x128xf32, #tpu.memory_space<vmem>>, vector<8x128xf32>
    %c0_2 = arith.constant 0 : index
    %c0_3 = arith.constant 0 : index
    %4 = vector.load %arg3[%c0_2, %c0_3] : memref<8x128xf32, #tpu.memory_space<vmem>>, vector<8x128xf32>
    %cst = arith.constant 0.000000e+00 : f32
    %5 = vector.broadcast %cst : f32 to vector<8x128xf32>
    %6 = arith.maximumf %3, %5 : vector<8x128xf32>
    %7 = arith.mulf %3, %4 : vector<8x128xf32>
    %8 = arith.subf %6, %7 : vector<8x128xf32>
    %9 = math.absf %3 : vector<8x128xf32>
    %cst_4 = arith.constant 0.000000e+00 : f32
    %10 = vector.broadcast %cst_4 : f32 to vector<8x128xf32>
    %11 = arith.subf %10, %9 : vector<8x128xf32>
    %12 = math.exp %11 : vector<8x128xf32>
    %13 = math.log1p %12 : vector<8x128xf32>
    %14 = arith.addf %8, %13 : vector<8x128xf32>
    %cst_5 = arith.constant 0.000000e+00 : f32
    %15 = vector.broadcast %cst_5 : f32 to vector<8x128xf32>
    %16 = arith.subf %15, %14 : vector<8x128xf32>
    %17 = math.exp %16 : vector<8x128xf32>
    %cst_6 = arith.constant 1.000000e+00 : f32
    %18 = vector.broadcast %cst_6 : f32 to vector<8x128xf32>
    %19 = arith.subf %18, %17 : vector<8x128xf32>
    %20 = arith.mulf %19, %19 : vector<8x128xf32>
    %21 = arith.mulf %14, %20 : vector<8x128xf32>
    %c0_7 = arith.constant 0 : index
    %c0_8 = arith.constant 0 : index
    %c0_9 = arith.constant 0 : index
    %22 = vector.load %arg4[%c0_7, %c0_8, %c0_9] : memref<1x8x128xf32, #tpu.memory_space<vmem>>, vector<1x8x128xf32>
    %23 = vector.shape_cast %22 : vector<1x8x128xf32> to vector<8x128xf32>
    %24 = vector.shape_cast %21 : vector<8x128xf32> to vector<1x8x128xf32>
    %cst_10 = arith.constant dense<0.000000e+00> : vector<8x128xf32>
    %25 = vector.multi_reduction <add>, %24, %cst_10 [0] : vector<1x8x128xf32> to vector<8x128xf32>
    %26 = arith.addf %23, %25 : vector<8x128xf32>
    %c0_11 = arith.constant 0 : index
    %c0_12 = arith.constant 0 : index
    %c0_13 = arith.constant 0 : index
    %27 = vector.load %arg4[%c0_11, %c0_12, %c0_13] : memref<1x8x128xf32, #tpu.memory_space<vmem>>, vector<1x8x128xf32>
    %28 = vector.shape_cast %27 : vector<1x8x128xf32> to vector<8x128xf32>
    %29 = vector.shape_cast %26 : vector<8x128xf32> to vector<1x8x128xf32>
    tpu.vector_store %arg4[%c0_11, %c0_12, %c0_13], %29 {strides = array<i32>} : memref<1x8x128xf32, #tpu.memory_space<vmem>>, vector<1x8x128xf32>,
    return
  }
  func.func @transform_0(%arg0: i32, %arg1: i32) -> (i32, i32) {
    %c1_i32 = arith.constant 1 : i32
    %0 = arith.muli %arg0, %c1_i32 : i32
    %1 = arith.addi %0, %arg1 : i32
    %c0_i32 = arith.constant 0 : i32
    %c0_i32_0 = arith.constant 0 : i32
    return %1, %c0_i32 : i32, i32
  }
  func.func @transform_1(%arg0: i32, %arg1: i32) -> (i32, i32) {
    %c1_i32 = arith.constant 1 : i32
    %0 = arith.muli %arg0, %c1_i32 : i32
    %1 = arith.addi %0, %arg1 : i32
    %c0_i32 = arith.constant 0 : i32
    %c0_i32_0 = arith.constant 0 : i32
    return %1, %c0_i32 : i32, i32
  }
  func.func @transform_2(%arg0: i32, %arg1: i32) -> (i32, i32, i32) {
    %c0_i32 = arith.constant 0 : i32
    %c0_i32_0 = arith.constant 0 : i32
    %c0_i32_1 = arith.constant 0 : i32
    return %arg0, %c0_i32, %c0_i32_0 : i32, i32, i32
  }
}

</mosaic_0001>

<bundles_post_ra>
// kernel: _lambda_.1
= control target key start
LH: loop header
LB: loop body
LE: loop exit
PB: predicated region body
PF: predicated region fallthrough
CT: control target
= control target key end

     0   :  { %s369_s9 = smov 0   ;;  %s371_s10 = smov 0   ;;  %s410_s0 = inlined_call_operand.vmem [shape: f32[16,128], index: 0, kind: input, shape index: {}]   ;;  %s411_s1 = inlined_call_operand.vmem [shape: f32[16,128], index: 1, kind: input, shape index: {}]   ;;  %s412_s2 = inlined_call_operand.vmem [shape: f32[2,8,128], index: 2, kind: output, shape index: {}]  }
   0x1   :  { %s373_s11 = smov 0  }
   0x2 LB: > { %s24_s12 = sadd.s32 1, %s348_s10  ;;  %p293_p0 = scmp.ge.s32.totalorder %s352_s11, 1  ;;  %s352_s11 = sphi %s373_s11, %s12_s11   ;;  %s348_s10 = sphi %s371_s10, %s414_s10   ;;  %s344_s9 = sphi %s369_s9, %s413_s9  }
   0x3   : > { %p26_p1 = scmp.ge.s32.totalorder %s24_s12, 2  ;;  %p140_p2 = scmp.lt.s32.totalorder %s352_s11, 3 }
   0x5   : > { %s416_s12 = smov (%p26_p1, %s24_s12), 0  ;;  %p141_p3 = pnand %p293_p0, %p140_p2 }
   0x6   : > { %p167_p4 = scmp.lt.s32.totalorder (!%p141_p3), %s344_s9, 1 }
   0x7   : > { %144 = sbr.rel (%p141_p3) target bundleno = 61 (0x3d), region = 28 }
   0xc   : > { %s418_s9 = smov (!%p167_p4, %s344_s9), 1 }
   0xd   : > { %s387_s13 = sshll.u32 %s418_s9, 3 }
   0xe   : > { %s170_s16 = scalar_lea.vmem %s410_s0, %s387_s13  ;;  %s176_s19 = scalar_lea.vmem %s411_s1, %s387_s13 }
   0xf   : > { %v187_v0 = vld [vmem:[%s170_s16] sm:$0xff]  ;;  %s181_s22 = scalar_lea.vmem %s412_s2, %s387_s13 }
  0x10   : > { %v192_v1 = vand.u32 2147483647, %v187_v0  ;;  %v188_v7 = vld [vmem:[%s176_s19] sm:$0xff]  ;;  %v189_v9 = vmax.f32 %v187_v0, 0.0 }
  0x11   : > { %v190_v10 = vmul.f32 %v188_v7, %v187_v0 }
  0x12   : > { %v193_v2 = vsub.f32 0.0, %v192_v1 }
  0x13   : > { %v191_v14 = vsub.f32 %v189_v9, %v190_v10 }
  0x14   : > { %v194_v3 = vmul.f32 1.442695, %v193_v2 }
  0x16   : > { %324 = vpow2.f32 %v194_v3 }
  0x1c   : > { %v325_v4 = vpop.eup %324 }
  0x1d   : > { %v196_v5 = vadd.f32 1.0, %v325_v4  ;;  %v199_v6 = vmul.f32 -0.5, %v325_v4  ;;  %v202_v11 = vand.u32 2147483647, %v325_v4 }
  0x1f   : > { %326 = vlog2.f32 %v196_v5  ;;  %v200_v8 = vadd.f32 1.0, %v199_v6  ;;  %vm203_vm0 = vcmp.lt.f32.partialorder %v202_v11, 0.0004427343 }
  0x21   : > { %v201_v12 = vmul.f32 %v325_v4, %v200_v8 }
  0x25   : > { %v327_v13 = vpop.eup %326 }
  0x26   : > { %v198_v15 = vmul.f32 0.6931472, %v327_v13 }
  0x28   : > { %v204_v16 = vsel %vm203_vm0, %v201_v12, %v198_v15 }
  0x29   : > { %v205_v17 = vadd.f32 %v204_v16, %v191_v14 }
  0x2b   : > { %v206_v18 = vsub.f32 0.0, %v205_v17 }
  0x2d   : > { %v207_v19 = vmul.f32 1.442695, %v206_v18 }
  0x2f   : > { %328 = vpow2.f32 %v207_v19 }
  0x35   : > { %v329_v20 = vpop.eup %328 }
  0x36   : > { %v209_v21 = vsub.f32 1.0, %v329_v20 }
  0x38   : > { %v210_v22 = vmul.f32 %v209_v21, %v209_v21 }
  0x3a   : > { %v211_v23 = vmul.f32 %v210_v22, %v205_v17 }
  0x3c   : > { %215 = vst [vmem:[%s181_s22] sm:$0xff] %v211_v23 }
  0x3d PF: > { %s12_s11 = sadd.s32 1, %s352_s11   ;;  %s413_s9 = smov %s348_s10 }
  0x3e   : > { %p9_p5 = scmp.ge.s32.totalorder %s12_s11, 4   ;;  %s414_s10 = smov %s416_s12 }
  0x40   :  { %11 = sbr.rel (!%p9_p5) target bundleno = 2 (0x2), region = 65 }

</bundles_post_ra>
